<compile_context>
chip_gen: v7x
topology: tpu7x:2x2x1
jax: 0.10.0
libtpu: 0.0.40
codegen_flags: <defaults>
</compile_context>

<pallas_src>
import jax
import jax.numpy as jnp
from jax.experimental import pallas as pl
from jax.experimental.pallas import tpu as pltpu

_LANE = 128


def _round_up(x: int, m: int) -> int:
    return ((x + m - 1) // m) * m


def feed_video_input(x: dict, w: jnp.ndarray, b: jnp.ndarray,
                     *, max_ts: int | None = None) -> jnp.ndarray:
    """Equivalent of FeedVideoInput(model).forward(x), model = avg-pool + Linear."""
    video = x["video"]                      # (B, C, T, H, W)  -- NCTHW
    B, C, T, H, W = video.shape
    S = T * H * W
    BC = B * C
    Hout = w.shape[1]
    itemsize = jnp.dtype(video.dtype).itemsize

    # Flatten (T, H, W) -> S and fold C into the rows: (B*C, S).  Contiguous
    # reshape (free in XLA); makes the sublane dim dense.
    video_flat = video.reshape(BC, S)

    # ---- Tile selection -----------------------------------------------------
    # Lane-multiple tile, double-buffered input stream <= ~8 MiB.
    budget_bytes = 8 << 20
    ts_cap = max(_LANE, (budget_bytes // (2 * BC * itemsize)) // _LANE * _LANE)
    if max_ts is not None:
        ts_cap = min(ts_cap, max(_LANE, _round_up(max_ts, _LANE)))
    S_lane = _round_up(S, _LANE)
    ts_cap = min(ts_cap, S_lane)

    # Minimal step count for this cap, then re-balance ts so padding < 128
    # lanes total (instead of up to a full tile).
    n_s = -(-S_lane // ts_cap)                       # cdiv
    ts = _round_up(-(-S_lane // n_s), _LANE)         # cdiv then lane-align
    S_pad = n_s * ts

    if S_pad != S:
        # Zero padding contributes 0 to the sum; we divide by the true S.
        video_flat = jnp.pad(video_flat, ((0, 0), (0, S_pad - S)))

    # ---- One-time host-side prep for the head (no in-kernel reshapes) -------
    #   w_scaled[r, h] = w[r % C, h] / S                 (B*C, Hout)
    #   sel_T[b, r]    = 1 if r // C == b else 0         (B, B*C)
    # so that  out = sel_T @ (row_sums * w_scaled) + bias.
    inv_S = 1.0 / float(S)
    w_scaled = jnp.tile(w.astype(jnp.float32) * inv_S, (B, 1))        # (BC, Hout)
    sel_T = jnp.repeat(jnp.eye(B, dtype=jnp.float32), C, axis=1)      # (B, BC)
    b2d = b.reshape(1, Hout).astype(jnp.float32)                      # (1, Hout)

    def kernel(video_ref, w_ref, sel_ref, b_ref, out_ref, acc_ref):
        s_idx = pl.program_id(0)

        @pl.when(s_idx == 0)
        def _init():
            acc_ref[...] = jnp.zeros_like(acc_ref)

        # Streaming partial sum over this S-chunk (f32 accumulation even for
        # narrow input dtypes).  Cross-lane reduce rides the XLU slot, which
        # has plenty of slack in an HBM-bound loop.
        v = video_ref[...].astype(jnp.float32)                        # (BC, ts)
        acc_ref[...] += jnp.sum(v, axis=-1, keepdims=True)            # (BC, 1)

        @pl.when(s_idx == n_s - 1)
        def _finalize():
            contrib = acc_ref[...] * w_ref[...]                       # (BC, Hout)  VPU
            out_ref[...] = (
                jnp.dot(sel_ref[...], contrib,
                        preferred_element_type=jnp.float32)           # (B, Hout)
                + b_ref[...]
            )

    cost = pl.CostEstimate(
        flops=BC * S + BC * Hout + 2 * B * BC * Hout,
        transcendentals=0,
        bytes_accessed=(BC * S_pad * itemsize          # video stream
                        + BC * Hout * 4                # scaled/tiled weight
                        + B * BC * 4 + Hout * 4        # selector + bias
                        + B * Hout * 4),               # output
    )

    return pl.pallas_call(
        kernel,
        grid=(n_s,),
        in_specs=[
            pl.BlockSpec((BC, ts), lambda s: (0, s)),       # streamed video chunks
            pl.BlockSpec((BC, Hout), lambda s: (0, 0)),     # scaled weight (resident)
            pl.BlockSpec((B, BC), lambda s: (0, 0)),        # selector (resident)
            pl.BlockSpec((1, Hout), lambda s: (0, 0)),      # bias (resident)
        ],
        out_specs=pl.BlockSpec((B, Hout), lambda s: (0, 0)),
        out_shape=jax.ShapeDtypeStruct((B, Hout), jnp.float32),
        scratch_shapes=[pltpu.VMEM((BC, 1), jnp.float32)],  # running-sum accumulator
        compiler_params=pltpu.CompilerParams(
            dimension_semantics=("arbitrary",),             # S is a reduction axis
            vmem_limit_bytes=32 * 1024 * 1024,
        ),
        cost_estimate=cost,
    )(video_flat, w_scaled, sel_T, b2d)


if __name__ == "__main__":
    # Small shapes consistent with a video input: (batch, channels, T, H, W).
    B, C, T, H, W = 2, 4, 4, 8, 8      # S = 256, B*C = 8 (sublane-dense)
    HIDDEN = 32

    key = jax.random.PRNGKey(0)
    k_vid, k_w, k_b = jax.random.split(key, 3)

    video = jax.random.normal(k_vid, (B, C, T, H, W), dtype=jnp.float32)
    w = jax.random.normal(k_w, (C, HIDDEN), dtype=jnp.float32) * 0.1
    b = jax.random.normal(k_b, (HIDDEN,), dtype=jnp.float32) * 0.01

    x = {"video": video}  # FeedVideoInput pulls the 'video' key from the dict

    # max_ts=128 so the demo actually exercises the multi-step streaming path
    # (grid of 2 S-chunks); production sizes use the full VMEM-budgeted tiles.
    out = feed_video_input(x, w, b, max_ts=128)
    out = jax.block_until_ready(out)

    # Pure-JAX reference.
    ref = jnp.mean(video.reshape(B, C, -1), axis=-1) @ w + b
    assert out.shape == (B, HIDDEN)
    assert jnp.allclose(out, ref, atol=1e-4, rtol=1e-4)

    print("KERNEL_OK")
</pallas_src>

<mosaic_0001>
module attributes {stable_mosaic.version = 11 : i64} {
  func.func @kernel(%arg0: i32, %arg1: memref<8x128xf32, #tpu.memory_space<vmem>>, %arg2: memref<8x32xf32, #tpu.memory_space<vmem>>, %arg3: memref<2x8xf32, #tpu.memory_space<vmem>>, %arg4: memref<1x32xf32, #tpu.memory_space<vmem>>, %arg5: memref<2x32xf32, #tpu.memory_space<vmem>>, %arg6: memref<8x1xf32, #tpu.memory_space<vmem>>) attributes {dimension_semantics = [#tpu.dimension_semantics<arbitrary>], iteration_bounds = array<i64: 2>, scalar_prefetch = 0 : i64, scratch_operands = 1 : i64, tpu.core_type = #tpu.core_type<tc>, window_params = [{transform_indices = @transform_0, window_bounds = array<i64: 8, 128>}, {pipeline_mode = #tpu.pipeline_mode<synchronous>, transform_indices = @transform_1, window_bounds = array<i64: 8, 32>}, {pipeline_mode = #tpu.pipeline_mode<synchronous>, transform_indices = @transform_2, window_bounds = array<i64: 2, 8>}, {pipeline_mode = #tpu.pipeline_mode<synchronous>, transform_indices = @transform_3, window_bounds = array<i64: 1, 32>}, {pipeline_mode = #tpu.pipeline_mode<synchronous>, transform_indices = @transform_4, window_bounds = array<i64: 2, 32>}]} {
    %c0_i32 = arith.constant 0 : i32
    %0 = arith.cmpi eq, %arg0, %c0_i32 : i32
    %1 = arith.extui %0 : i1 to i32
    %c0_i32_0 = arith.constant 0 : i32
    %2 = arith.cmpi ne, %1, %c0_i32_0 : i32
    scf.if %2 {
      %cst_7 = arith.constant 0.000000e+00 : f32
      %12 = vector.broadcast %cst_7 : f32 to vector<8x1xf32>
      %c0_8 = arith.constant 0 : index
      %c0_9 = arith.constant 0 : index
      %13 = vector.load %arg6[%c0_8, %c0_9] : memref<8x1xf32, #tpu.memory_space<vmem>>, vector<8x1xf32>
      tpu.vector_store %arg6[%c0_8, %c0_9], %12 {strides = array<i32>} : memref<8x1xf32, #tpu.memory_space<vmem>>, vector<8x1xf32>,
    } else {
    }
    %c0 = arith.constant 0 : index
    %c0_1 = arith.constant 0 : index
    %3 = vector.load %arg1[%c0, %c0_1] : memref<8x128xf32, #tpu.memory_space<vmem>>, vector<8x128xf32>
    %c0_2 = arith.constant 0 : index
    %c0_3 = arith.constant 0 : index
    %4 = vector.load %arg6[%c0_2, %c0_3] : memref<8x1xf32, #tpu.memory_space<vmem>>, vector<8x1xf32>
    %cst = arith.constant dense<0.000000e+00> : vector<8xf32>
    %5 = vector.multi_reduction <add>, %3, %cst [1] : vector<8x128xf32> to vector<8xf32>
    %6 = vector.shape_cast %5 : vector<8xf32> to vector<8x1xf32>
    %7 = arith.addf %4, %6 : vector<8x1xf32>
    %c0_4 = arith.constant 0 : index
    %c0_5 = arith.constant 0 : index
    %8 = vector.load %arg6[%c0_4, %c0_5] : memref<8x1xf32, #tpu.memory_space<vmem>>, vector<8x1xf32>
    tpu.vector_store %arg6[%c0_4, %c0_5], %7 {strides = array<i32>} : memref<8x1xf32, #tpu.memory_space<vmem>>, vector<8x1xf32>,
    %c1_i32 = arith.constant 1 : i32
    %9 = arith.cmpi eq, %arg0, %c1_i32 : i32
    %10 = arith.extui %9 : i1 to i32
    %c0_i32_6 = arith.constant 0 : i32
    %11 = arith.cmpi ne, %10, %c0_i32_6 : i32
    scf.if %11 {
      %c0_7 = arith.constant 0 : index
      %c0_8 = arith.constant 0 : index
      %12 = vector.load %arg6[%c0_7, %c0_8] : memref<8x1xf32, #tpu.memory_space<vmem>>, vector<8x1xf32>
      %c0_9 = arith.constant 0 : index
      %c0_10 = arith.constant 0 : index
      %13 = vector.load %arg2[%c0_9, %c0_10] : memref<8x32xf32, #tpu.memory_space<vmem>>, vector<8x32xf32>
      %14 = vector.broadcast %12 : vector<8x1xf32> to vector<8x32xf32>
      %15 = arith.mulf %14, %13 : vector<8x32xf32>
      %c0_11 = arith.constant 0 : index
      %c0_12 = arith.constant 0 : index
      %16 = vector.load %arg3[%c0_11, %c0_12] : memref<2x8xf32, #tpu.memory_space<vmem>>, vector<2x8xf32>
      %cst_13 = arith.constant dense<0.000000e+00> : vector<2x32xf32>
      %17 = tpu.matmul %16, %15, %cst_13 {dimension_numbers = #tpu.dot_dimension_numbers<[1], [0], [0], [1], [0, 0, 1, 1], [], []>} : vector<2x8xf32>, vector<8x32xf32>, vector<2x32xf32> -> vector<2x32xf32>
      %c0_14 = arith.constant 0 : index
      %c0_15 = arith.constant 0 : index
      %18 = vector.load %arg4[%c0_14, %c0_15] : memref<1x32xf32, #tpu.memory_space<vmem>>, vector<1x32xf32>
      %19 = vector.broadcast %18 : vector<1x32xf32> to vector<2x32xf32>
      %20 = arith.addf %17, %19 : vector<2x32xf32>
      %c0_16 = arith.constant 0 : index
      %c0_17 = arith.constant 0 : index
      %21 = vector.load %arg5[%c0_16, %c0_17] : memref<2x32xf32, #tpu.memory_space<vmem>>, vector<2x32xf32>
      tpu.vector_store %arg5[%c0_16, %c0_17], %20 {strides = array<i32>} : memref<2x32xf32, #tpu.memory_space<vmem>>, vector<2x32xf32>,
    } else {
    }
    return
  }
  func.func @transform_0(%arg0: i32) -> (i32, i32) {
    %c0_i32 = arith.constant 0 : i32
    %c0_i32_0 = arith.constant 0 : i32
    return %c0_i32, %arg0 : i32, i32
  }
  func.func @transform_1(%arg0: i32) -> (i32, i32) {
    %c0_i32 = arith.constant 0 : i32
    %c0_i32_0 = arith.constant 0 : i32
    %c0_i32_1 = arith.constant 0 : i32
    return %c0_i32, %c0_i32_0 : i32, i32
  }
  func.func @transform_2(%arg0: i32) -> (i32, i32) {
    %c0_i32 = arith.constant 0 : i32
    %c0_i32_0 = arith.constant 0 : i32
    %c0_i32_1 = arith.constant 0 : i32
    return %c0_i32, %c0_i32_0 : i32, i32
  }
  func.func @transform_3(%arg0: i32) -> (i32, i32) {
    %c0_i32 = arith.constant 0 : i32
    %c0_i32_0 = arith.constant 0 : i32
    %c0_i32_1 = arith.constant 0 : i32
    return %c0_i32, %c0_i32_0 : i32, i32
  }
  func.func @transform_4(%arg0: i32) -> (i32, i32) {
    %c0_i32 = arith.constant 0 : i32
    %c0_i32_0 = arith.constant 0 : i32
    %c0_i32_1 = arith.constant 0 : i32
    return %c0_i32, %c0_i32_0 : i32, i32
  }
}

</mosaic_0001>

<bundles_post_ra>
// kernel: tpu_custom_call.1
= control target key start
LH: loop header
LB: loop body
LE: loop exit
PB: predicated region body
PF: predicated region fallthrough
CT: control target
= control target key end

     0   :  { %9 = vsyncpa [#allocation4], 0  ;;  %s812_s0 = inlined_call_operand.hbm [shape: f32[8,256], index: 0, kind: input, shape index: {}]   ;;  %s813_s1 = inlined_call_operand.hbm [shape: f32[8,32], index: 1, kind: input, shape index: {}]   ;;  %s814_s2 = inlined_call_operand.vmem [shape: f32[2,8], index: 2, kind: input, shape index: {}]   ;;  %s815_s3 = inlined_call_operand.vmem [shape: f32[1,32], index: 3, kind: input, shape index: {}]   ;;  %s816_s4 = inlined_call_operand.hbm [shape: f32[2,32], index: 4, kind: output, shape index: {}]  }
   0x1   :  { %11 = vsyncpa [#allocation4 + $0x1], 0 }
   0x2   :  { %12 = vsyncpa [#allocation7], 0 }
   0x3   :  { %13 = vsyncpa [#allocation5], 0  ;;  %s636_s15 = smov 0   ;;  %s638_s16 = smov 0  }
   0x4   :  { %s640_s17 = smov 0   ;;  %s642_s18 = smov 0  }
   0x5 LB: > { %s655_s19 = sadd.s32 4294967295, %s602_s18   ;;  %p39_p0 = scmp.ne.s32.totalorder %s594_s16, %s590_s15  ;;  %s602_s18 = sphi %s642_s18, %s835_s18   ;;  %s598_s17 = sphi %s640_s17, %s834_s17   ;;  %s594_s16 = sphi %s638_s16, %s833_s16   ;;  %s590_s15 = sphi %s636_s15, %s832_s15  }
   0x6   : > { %p817_p1 = scmp.eq.s32.totalorder %s655_s19, 0  ;;  %p391_p2 = scmp.ge.s32.totalorder %s602_s18, 1 }
   0x7   : > { %p134_p3 = scmp.lt.s32.totalorder %s602_s18, 3  ;;  %s604_s22 = smov [#allocation6]  }
   0x8   : > { %p664_p5 = por %p817_p1, %p39_p0  ;;  %s147_s23 = sshll.u32 %s604_s22, 4  ;;  %s148_s23 = int_to_ptr.vmem [resolvable:$true] %s147_s23 }
   0x9   : > { %p668_p6 = pnand %p391_p2, %p134_p3  ;;  %s675_s24 = sadd.s32 1, %s602_s18  }
   0xa   : > { %s820_s20 = scalar_select %p664_p5, 1, 0 }
   0xb   : > { %s821_s21 = scalar_select %p668_p6, 1, 0 }
   0xc   : > { %p424_p7 = pneg %p668_p6  ;;  %s23_s26 = ssub.s32 %s602_s18, %s675_s24 }
   0xd   : > { %p685_p9 = scmp.eq.s32.totalorder %s23_s26, 0  ;;  %s26_s28 = sadd.s32 1, %s598_s17 }
   0xe   : > { %p679_p8 = pnand %p424_p7, %p817_p1  ;;  %s476_s5 = scalar_lea.hbm %s813_s1, 128 }
   0xf   : > { %s823_s27 = scalar_select %p685_p9, 1, 0 }
  0x10   : > { %p477_p11 = scmp.ne.s32.totalorder %s813_s1, %s476_s5  ;;  %p478_p12 = pneg %p679_p8 }
  0x11   : > { %p483_p2 = scmp.lt.u32.totalorder %s476_s5, %s813_s1 }
  0x12   : > { %p479_p13 = pnand %p478_p12, %p477_p11 }
  0x14   : > { %p480_p0 = pneg %p479_p13 }
  0x16   : > { %p485_p3 = pnand %p483_p2, %p480_p0 }
  0x18   : > { %488 = shalt.err (!%p485_p3)
}
  0x19   : > { %s489_s10 = scalar_lea.vmem %s148_s23, 128  ;;  %p497_p10 = scmp.lt.s32.totalorder %s148_s23, %s148_s23 }
  0x1a   : > { %p490_p7 = scmp.ne.s32.totalorder %s148_s23, %s489_s10  ;;  %p498_p5 = scmp.lt.s32.totalorder %s489_s10, %s489_s10 }
  0x1c   : > { %p492_p4 = pnand %p490_p7, %p478_p12  ;;  %p499_p6 = por %p498_p5, %p497_p10 }
  0x1e   : > { %p493_p1 = pneg %p492_p4 }
  0x20   : > { %p500_p9 = pnand %p499_p6, %p493_p1 }
  0x22   : > { %503 = shalt.err (!%p500_p9)
}
  0x23   : > { %427 = dma.hbm_to_vmem [thread:$0]  (!%p679_p8), %s813_s1, 128, %s148_s23, [#allocation7]  }
  0x24   : > { %p824_p4 = scmp.ne.s32.totalorder %s823_s27, 0  ;;  %p34_p5 = scmp.eq.s32.totalorder %s602_s18, 0 }
  0x25   : > { %p433_p1 = scmp.lt.s32.totalorder %s602_s18, 2  ;;  %s164_s14 = sand.u32 1, %s598_s17  }
  0x26   : > { %s711_s13 = scalar_select %p824_p4, %s598_s17, %s26_s28  }
  0x27   : > { %s395_s15 = sshll.u32 %s602_s18, 7  ;;  %p825_p6 = scmp.ne.s32.totalorder %s598_s17, %s594_s16 }
  0x28   : > { %s394_s22 = sshll.u32 %s164_s14, 3  ;;  %s723_s29 = scalar_lea.hbm %s812_s0, %s395_s15 }
  0x29   : > { %p35_p9 = por %p34_p5, %p825_p6  ;;  %s168_s27 = scalar_lea.vmem [#allocation3], %s394_s22 }
  0x2a   : > { %s175_s18 = sshll.u32 %s168_s27, 4  ;;  %s165_s28 = scalar_lea.sflag [#allocation4], %s164_s14  ;;  %s729_s18 = int_to_ptr.vmem [resolvable:$true] %s175_s18 }
  0x2b   : > { %p725_p8 = pnand %p433_p1, %p35_p9  ;;  %s504_s30 = scalar_lea.hbm %s723_s29, 128 }
  0x2c   : > { %p505_p10 = scmp.ne.s32.totalorder %s723_s29, %s504_s30  ;;  %s509_s7 = scalar_lea.hbm %s812_s0, 256 }
  0x2d   : > { %p506_p11 = pneg %p725_p8  ;;  %p510_p0 = scmp.lt.u32.totalorder %s723_s29, %s812_s0 }
  0x2e   : > { %p511_p2 = scmp.lt.u32.totalorder %s509_s7, %s504_s30  ;;  %p513_p7 = scmp.lt.u32.totalorder %s504_s30, %s723_s29 }
  0x2f   : > { %p507_p12 = pnand %p506_p11, %p505_p10 }
  0x30   : > { %p512_p3 = por %p511_p2, %p510_p0 }
  0x31   : > { %p508_p13 = pneg %p507_p12 }
  0x32   : > { %p514_p4 = por %p513_p7, %p512_p3 }
  0x34   : > { %p515_p5 = pnand %p514_p4, %p508_p13 }
  0x36   : > { %518 = shalt.err (!%p515_p5)
}
  0x37   : > { %s519_s10 = scalar_lea.vmem %s729_s18, 128  ;;  %s605_s11 = smov [#allocation3]  }
  0x38   : > { %p520_p1 = scmp.ne.s32.totalorder %s729_s18, %s519_s10  ;;  %s524_s12 = sshll.u32 %s605_s11, 4  ;;  %s525_s12 = int_to_ptr.vmem [resolvable:$false] %s524_s12 }
  0x39   : > { %s526_s14 = scalar_lea.vmem %s525_s12, 256  ;;  %p527_p10 = scmp.lt.s32.totalorder %s729_s18, %s525_s12 }
  0x3a   : > { %p522_p6 = pnand %p520_p1, %p506_p11  ;;  %p528_p12 = scmp.lt.s32.totalorder %s526_s14, %s519_s10 }
  0x3c   : > { %p523_p9 = pneg %p522_p6  ;;  %p529_p0 = por %p528_p12, %p527_p10 }
  0x3e   : > { %p530_p2 = pnand %p529_p0, %p523_p9 }
  0x40   : > { %533 = shalt.err (!%p530_p2)
}
  0x41   : > { %431 = dma.hbm_to_vmem [thread:$0]  (!%p725_p8), %s723_s29, 128, %s729_s18, %s165_s28  }
  0x42   : > { %p827_p13 = scmp.ne.s32.totalorder %s821_s21, 0 }
  0x43   : > { %s186_s15 = sand.u32 (!%p827_p13), 1, %s594_s16   ;;  %p828_p11 = scmp.ne.s32.totalorder (!%p827_p13), %s820_s20, 0 }
  0x44   : > { %184 = sbr.rel (%p827_p13) target bundleno = 612 (0x264), region = 36  ;;  %s397_s22 = sshll.u32 (!%p827_p13), %s186_s15, 3 }
  0x45   : > { %s187_s25 = scalar_lea.sflag (!%p827_p13), [#allocation4], %s186_s15  ;;  %s190_s26 = scalar_lea.vmem (!%p827_p13), [#allocation3], %s397_s22 }
  0x4b   : > { %577 = dma.done.wait (%p828_p11), %s187_s25, 128  }
  0x4c   : > { %579 = vsyncadd (%p828_p11), %s187_s25, 4294967168  ;;  %p829_p3 = scmp.eq.s32.totalorder %s655_s19, 0 }
  0x4e   : > { %581 = dma.done.wait (%p829_p3), [#allocation7], 128   ;;  %p830_p7 = pmov %p829_p3 }
  0x4f   : > { %p831_p8 = scmp.ne.s32.totalorder %s655_s19, 0 }
  0x50   : > { %583 = vsyncadd (%p830_p7), [#allocation7], 4294967168  ;;  %vm218_vm0 = vcmask (!%p831_p8), 7168   ;;  %v606_v0 = vmov (!%p831_p8), 0.0  }
  0x51   : > { %217 = sbr.rel (%p831_p8) target bundleno = 88 (0x58), region = 48  ;;  %219 = vst.msk [vmem:[#allocation2] sm:$0xff] (!%p831_p8), %vm218_vm0, %v606_v0 }
  0x58 PF: > { %v220_v1 = vld [vmem:[%s190_s26] sm:$0xff]  ;;  %v221_v2 = vld [vmem:[#allocation2] sm:$0xff]  ;;  %vm225_vm1 = vcmask 7168   ;;  %p400_p4 = scmp.ne.s32.totalorder %s655_s19, 1 }
  0x59   : > { %222 = vadd.xlane.f32.xlu0 %v220_v1  ;;  %v607_v6 = vmov (!%p400_p4), 0   ;;  %v608_v7 = vmov (!%p400_p4), 0.0   ;;  %vm609_vm2 = vmmov (!%p400_p4), 0   ;;  %v232_v8 = vld [vmem:[#allocation6] sm:$0xff] (!%p400_p4)  ;;  %v239_v11 = vld [vmem:[%s814_s2] sm:$0x3] (!%p400_p4) }
  0x5a   : > { %475 = vset.pattern.permute.xlu0 (!%p400_p4), %v607_v6  ;;  %409 = vmatprep.subr.mxu0 (!%p400_p4), %v608_v7  ;;  %vm247_vm3 = vcmask (!%p400_p4), 64512   ;;  %v401_v12 = vld [vmem:[%s815_s3] ss:$0 sm:$0xff] (!%p400_p4)  ;;  %vm321_vm4 = vcmask (!%p400_p4), 254976  }
  0x5b   : > { %411 = vmatprep.mubr.msk.f32.mxu0 (!%p400_p4), %vm609_vm2, %v608_v7 }
  0xe3   : > { %230 = sbr.rel (%p400_p4) target bundleno = 587 (0x24b), region = 52 }
  0xe6   : > { %v223_v3 = vpop.xlane.xlu0 %222 }
  0xe7   : > { %v224_v4 = vadd.f32 %v223_v3, %v221_v2 }
  0xe9   : > { %226 = vst.msk [vmem:[#allocation2] sm:$0xff] %vm225_vm1, %v224_v4 }
  0xf0   : > { %v231_v5 = vld [vmem:[#allocation2] sm:$0xff] }
  0xf1   : > { %235 = vperm.xlu0 %475, %v231_v5  }
 0x170   : > { %v236_v9 = vpop.permute.xlu0 %235 }
 0x171   : > { %v238_v10 = vmul.f32 %v236_v9, %v232_v8 }
 0x173   : > { %410 = vmatpush3.msra.mxu0 %v238_v10 }
 0x174   : > { %412 = vmatmul.mubr.msk.f32.vlgmr.msra.gmra.mrb[0].mxu0 %vm247_vm3, %v239_v11 }
 0x247   : > { %v317_v13 = vpop.f32.mrb[0].mxu0 }
 0x248   : > { %v318_v14 = vadd.f32 %v401_v12, %v317_v13  ;;  %v413_v15 = vpop.f32.mrb[1].mxu0 }
 0x24a   : > { %322 = vst.msk [vmem:[#allocation8] sm:$0x3] %vm321_vm4, %v318_v14 }
 0x24b PF: > { %p435_p5 = scmp.eq.s32.totalorder %s655_s19, 1  ;;  %s610_s27 = smov [#allocation8]  }
 0x24c   : > { %s330_s18 = sshll.u32 %s610_s27, 4  ;;  %s331_s18 = int_to_ptr.vmem [resolvable:$true] %s330_s18 }
 0x24d   : > { %s534_s28 = scalar_lea.vmem %s331_s18, 32  ;;  %p541_p10 = scmp.lt.s32.totalorder %s331_s18, %s331_s18 }
 0x24e   : > { %p535_p1 = scmp.ne.s32.totalorder %s331_s18, %s534_s28  ;;  %p542_p12 = scmp.lt.s32.totalorder %s534_s28, %s534_s28 }
 0x250   : > { %p536_p6 = pnand %p535_p1, %p435_p5  ;;  %p543_p0 = por %p542_p12, %p541_p10 }
 0x252   : > { %p537_p9 = pneg %p536_p6 }
 0x254   : > { %p544_p2 = pnand %p543_p0, %p537_p9 }
 0x256   : > { %547 = shalt.err (!%p544_p2)
}
 0x257   : > { %s548_s6 = scalar_lea.hbm %s816_s4, 32 }
 0x258   : > { %p549_p13 = scmp.ne.s32.totalorder %s816_s4, %s548_s6  ;;  %p554_p7 = scmp.lt.u32.totalorder %s548_s6, %s816_s4 }
 0x25a   : > { %p550_p11 = pnand %p549_p13, %p435_p5 }
 0x25c   : > { %p551_p3 = pneg %p550_p11 }
 0x25e   : > { %p556_p8 = pnand %p554_p7, %p551_p3 }
 0x260   : > { %559 = shalt.err (!%p556_p8)
}
 0x261   : > { %421 = dma.vmem_to_hbm [thread:$0]  (%p435_p5), %s331_s18, 32, %s816_s4, [#allocation5]  }
 0x262   : > { %585 = dma.done.wait (%p435_p5), [#allocation5], 32  }
 0x263   : > { %587 = vsyncadd (%p435_p5), [#allocation5], 4294967264 }
 0x264 PF: > { %p16_p4 = scmp.ge.s32.totalorder %s675_s24, 4   ;;  %s832_s15 = smov %s594_s16 }
 0x265   : > { %s833_s16 = smov %s598_s17  ;;  %s834_s17 = smov %s711_s13 }
 0x266   : > { %s835_s18 = smov %s675_s24  ;;  %18 = sbr.rel (!%p16_p4) target bundleno = 5 (0x5), region = 85 }
 0x26d   :  { %343 = vsyncpa [#allocation4], 1 }
 0x26e   :  { %345 = vsyncpa [#allocation4 + $0x1], 1 }
 0x26f   :  { %346 = vsyncpa [#allocation7], 1 }
 0x270   :  { %347 = vsyncpa [#allocation5], 1 }
 0x271   :  { %349 = vsyncpa [#allocation5 + $0x1], 1 }

</bundles_post_ra>
